<compile_context>
chip_gen: v6e
topology: v6e:2x2x1
jax: 0.10.0
libtpu: 0.0.40
codegen_flags: <defaults>
</compile_context>

<pallas_src>
import jax
import jax.numpy as jnp
from jax import lax
from jax.experimental import pallas as pl
from jax.experimental.pallas import tpu as pltpu


def _make_kernel(chunk, s_pad):
    assert chunk % 8 == 0

    def kernel(tok_ids_ref, tok_emb_hbm, pos_ref, out_ref, gather_buf, sems):
        b = pl.program_id(0)
        c = pl.program_id(1)
        nc = pl.num_programs(1)
        slot = c % 2

        def issue_chunk(chunk_idx, dst_slot):
            """Issue all row-gather DMAs for one chunk against one shared sem."""
            base = b * s_pad + chunk_idx * chunk

            def body(i, carry):
                r0 = pl.multiple_of(i * 8, 8)
                for dr in range(8):  # modest unroll: 8 DMA issues per iteration
                    r = r0 + dr
                    tok_id = tok_ids_ref[base + r]
                    pltpu.make_async_copy(
                        tok_emb_hbm.at[pl.ds(tok_id, 1), :],
                        gather_buf.at[dst_slot, pl.ds(r, 1), :],
                        sems.at[dst_slot],
                    ).start()
                return carry

            lax.fori_loop(0, chunk // 8, body, 0)

        # Prime the pipeline on the first chunk of this batch row.
        @pl.when(c == 0)
        def _():
            issue_chunk(0, slot)

        # Prefetch the next chunk (same batch row) before computing this one so
        # its HBM gather latency overlaps the add + output writeback below.
        @pl.when(c + 1 < nc)
        def _():
            issue_chunk(c + 1, 1 - slot)

        # One aggregate wait: every row copy for this slot signalled the same
        # DMA semaphore; waiting on the full (chunk, D) destination waits for
        # their combined byte count.
        pltpu.make_async_copy(
            gather_buf.at[slot], gather_buf.at[slot], sems.at[slot]
        ).wait()

        tok_rows = gather_buf[slot]
        acc = tok_rows + pos_ref[...].astype(tok_rows.dtype)
        out_ref[...] = acc.astype(out_ref.dtype)

    return kernel


def _pick_chunk(S, max_chunk=512):
    """Multiple of 8, preferably dividing S exactly (avoids the post-slice)."""
    if S % 8 == 0:
        c = min(max_chunk, S)
        c -= c % 8
        while c >= 8:
            if S % c == 0:
                return c
            c -= 8
    return min(max_chunk, ((S + 7) // 8) * 8)


def clip_embedding_forward(tokens, token_embedding, position_embedding, *, chunk=None):
    """CLIPEmbedding forward: token_embedding[tokens] + position_embedding[:S].

    tokens:             (B, S) integer ids
    token_embedding:    (V, D)
    position_embedding: (S_max, D), with S <= S_max
    returns:            (B, S, D) in token_embedding.dtype
    """
    B, S = tokens.shape
    V, D = token_embedding.shape
    S_max, D2 = position_embedding.shape
    assert D2 == D, "embedding dims must match"
    assert S <= S_max, "sequence longer than max_seq_length"

    if chunk is None:
        chunk = _pick_chunk(S)
    assert chunk % 8 == 0
    num_chunks = pl.cdiv(S, chunk)
    s_pad = num_chunks * chunk

    # Clamp ids: an out-of-range token would otherwise drive an OOB HBM DMA.
    tok = jnp.clip(tokens.astype(jnp.int32), 0, V - 1)
    if s_pad != S:
        tok = jnp.pad(tok, ((0, 0), (0, s_pad - S)))  # padded rows gather row 0
    tok_flat = tok.reshape(B * s_pad)

    # Only the position rows actually used, zero-padded to the chunk grid.
    pos = position_embedding[:S].astype(token_embedding.dtype)
    if s_pad != S:
        pos = jnp.pad(pos, ((0, s_pad - S), (0, 0)))

    out_dtype = token_embedding.dtype

    grid_spec = pltpu.PrefetchScalarGridSpec(
        # Token ids -> SMEM; needed so step c can look one chunk ahead.
        num_scalar_prefetch=1,
        grid=(B, num_chunks),
        in_specs=[
            # Vocab table stays in HBM; rows are gathered manually via DMA.
            pl.BlockSpec(memory_space=pl.ANY),
            # Position table: per-chunk tile (fits v7x VMEM for long sequences).
            pl.BlockSpec((chunk, D), lambda b, c, tok: (c, 0)),
        ],
        out_specs=pl.BlockSpec(
            (chunk, D), lambda b, c, tok: (b * num_chunks + c, 0)),
        scratch_shapes=[
            pltpu.VMEM((2, chunk, D), token_embedding.dtype),  # double-buffered gather
            pltpu.SemaphoreType.DMA((2,)),                     # one shared sem per slot
        ],
    )

    out_flat = pl.pallas_call(
        _make_kernel(chunk, s_pad),
        grid_spec=grid_spec,
        out_shape=jax.ShapeDtypeStruct((B * s_pad, D), out_dtype),
        compiler_params=pltpu.CompilerParams(
            # Chunk axis must stay sequential: step c prefetches chunk c+1.
            dimension_semantics=("parallel", "arbitrary")),
    )(tok_flat, token_embedding, pos)

    out = out_flat.reshape(B, s_pad, D)
    if s_pad != S:
        out = out[:, :S, :]  # only taken when S isn't a multiple of 8
    return out


if __name__ == "__main__":
    # Small shapes consistent with the module: vocab=64, embed_dim=128,
    # max_seq_length=16, batch=2, seq=8.
    vocab_size, embed_dim, max_seq = 64, 128, 16
    B, S = 2, 8

    key = jax.random.PRNGKey(0)
    k_emb, k_pos, k_tok = jax.random.split(key, 3)

    # nn.Embedding default init ~ N(0, 1).
    token_embedding = jax.random.normal(k_emb, (vocab_size, embed_dim), jnp.float32)
    # Module init uses zeros for the position parameter; use small nonzero
    # deterministic values so the add path is actually exercised.
    position_embedding = 0.01 * jax.random.normal(k_pos, (max_seq, embed_dim), jnp.float32)

    tokens = jax.random.randint(k_tok, (B, S), 0, vocab_size, dtype=jnp.int32)

    out = jax.block_until_ready(
        clip_embedding_forward(tokens, token_embedding, position_embedding))
    ref = token_embedding[tokens] + position_embedding[:S][None, :, :]
    assert out.shape == (B, S, embed_dim)
    assert out.dtype == jnp.float32
    assert jnp.allclose(out, ref, atol=1e-6), "kernel output mismatch vs reference"

    # Multi-chunk path (exercises the cross-step DMA prefetch): S=16, chunk=8.
    S2 = 16
    tokens2 = jax.random.randint(jax.random.PRNGKey(1), (B, S2), 0, vocab_size,
                                 dtype=jnp.int32)
    out2 = jax.block_until_ready(
        clip_embedding_forward(tokens2, token_embedding, position_embedding, chunk=8))
    ref2 = token_embedding[tokens2] + position_embedding[:S2][None, :, :]
    assert jnp.allclose(out2, ref2, atol=1e-6), "multi-chunk mismatch vs reference"

    # Padded path (S not a multiple of 8).
    S3 = 5
    tokens3 = jax.random.randint(jax.random.PRNGKey(2), (B, S3), 0, vocab_size,
                                 dtype=jnp.int32)
    out3 = jax.block_until_ready(
        clip_embedding_forward(tokens3, token_embedding, position_embedding))
    ref3 = token_embedding[tokens3] + position_embedding[:S3][None, :, :]
    assert out3.shape == (B, S3, embed_dim)
    assert jnp.allclose(out3, ref3, atol=1e-6), "padded-path mismatch vs reference"

    print("KERNEL_OK")
</pallas_src>

<mosaic_0001>
module attributes {stable_mosaic.version = 11 : i64} {
  func.func @kernel(%arg0: i32, %arg1: i32, %arg2: memref<16xi32, #tpu.memory_space<smem>>, %arg3: memref<64x128xf32, #tpu.memory_space<any>>, %arg4: memref<8x128xf32, #tpu.memory_space<vmem>>, %arg5: memref<8x128xf32, #tpu.memory_space<vmem>>, %arg6: memref<2x8x128xf32, #tpu.memory_space<vmem>>, %arg7: memref<2x!tpu.dma_semaphore, #tpu.memory_space<semaphore_mem>>) attributes {dimension_semantics = [#tpu.dimension_semantics<parallel>, #tpu.dimension_semantics<arbitrary>], iteration_bounds = array<i64: 2, 1>, scalar_prefetch = 1 : i64, scratch_operands = 2 : i64, tpu.core_type = #tpu.core_type<tc>, window_params = [{}, {transform_indices = @transform_1, window_bounds = array<i64: 8, 128>}, {transform_indices = @transform_2, window_bounds = array<i64: 8, 128>}]} {
    %c2_i32 = arith.constant 2 : i32
    %c0_i32 = arith.constant 0 : i32
    %0 = arith.cmpi eq, %c2_i32, %c0_i32 : i32
    %c1_i32 = arith.constant 1 : i32
    %1 = arith.select %0, %c1_i32, %c2_i32 : i32
    %2 = arith.remsi %arg1, %1 : i32
    %c0_i32_0 = arith.constant 0 : i32
    %3 = arith.cmpi ne, %2, %c0_i32_0 : i32
    %c0_i32_1 = arith.constant 0 : i32
    %4 = arith.cmpi slt, %2, %c0_i32_1 : i32
    %c0_i32_2 = arith.constant 0 : i32
    %5 = arith.cmpi slt, %1, %c0_i32_2 : i32
    %6 = arith.xori %4, %5 : i1
    %7 = arith.andi %6, %3 : i1
    %8 = arith.addi %2, %1 : i32
    %9 = arith.select %7, %8, %2 : i32
    %c0_i32_3 = arith.constant 0 : i32
    %10 = arith.cmpi eq, %arg1, %c0_i32_3 : i32
    %11 = arith.extui %10 : i1 to i32
    %c0_i32_4 = arith.constant 0 : i32
    %12 = arith.cmpi ne, %11, %c0_i32_4 : i32
    scf.if %12 {
      %c8_i32 = arith.constant 8 : i32
      %29 = arith.muli %arg0, %c8_i32 : i32
      %c0_i32_17 = arith.constant 0 : i32
      %30 = arith.addi %29, %c0_i32_17 : i32
      %c0_i32_18 = arith.constant 0 : i32
      %c8_i32_19 = arith.constant 8 : i32
      %31 = arith.muli %c0_i32_18, %c8_i32_19 : i32
      %32 = tpu.assume_multiple %31, 8 : i32
      %c0_i32_20 = arith.constant 0 : i32
      %33 = arith.addi %32, %c0_i32_20 : i32
      %34 = arith.addi %30, %33 : i32
      %35 = arith.index_cast %34 : i32 to index
      %36 = memref.load %arg2[%35] : memref<16xi32, #tpu.memory_space<smem>>
      %c0_i32_21 = arith.constant 0 : i32
      %37 = tpu.memref_slice %arg3[%36, %c0_i32_21] : memref<64x128xf32, #tpu.memory_space<any>> -> memref<1x128xf32, #tpu.memory_space<any>>
      %c0_i32_22 = arith.constant 0 : i32
      %38 = tpu.memref_slice %arg6[%9, %33, %c0_i32_22] : memref<2x8x128xf32, #tpu.memory_space<vmem>> -> memref<1x1x128xf32, #tpu.memory_space<vmem>>
      %39 = tpu.memref_squeeze %38 : memref<1x1x128xf32, #tpu.memory_space<vmem>> -> memref<1x128xf32, #tpu.memory_space<vmem>>
      %40 = tpu.memref_slice %arg7[%9] : memref<2x!tpu.dma_semaphore, #tpu.memory_space<semaphore_mem>> -> memref<1x!tpu.dma_semaphore, #tpu.memory_space<semaphore_mem>>
      %41 = tpu.memref_squeeze %40 : memref<1x!tpu.dma_semaphore, #tpu.memory_space<semaphore_mem>> -> memref<!tpu.dma_semaphore, #tpu.memory_space<semaphore_mem>>
      tpu.enqueue_dma source(%37 : memref<1x128xf32, #tpu.memory_space<any>>) target(%39 : memref<1x128xf32, #tpu.memory_space<vmem>>) target_semaphore(%41 : memref<!tpu.dma_semaphore, #tpu.memory_space<semaphore_mem>>)
      %c1_i32_23 = arith.constant 1 : i32
      %42 = arith.addi %32, %c1_i32_23 : i32
      %43 = arith.addi %30, %42 : i32
      %44 = arith.index_cast %43 : i32 to index
      %45 = memref.load %arg2[%44] : memref<16xi32, #tpu.memory_space<smem>>
      %c0_i32_24 = arith.constant 0 : i32
      %46 = tpu.memref_slice %arg3[%45, %c0_i32_24] : memref<64x128xf32, #tpu.memory_space<any>> -> memref<1x128xf32, #tpu.memory_space<any>>
      %c0_i32_25 = arith.constant 0 : i32
      %47 = tpu.memref_slice %arg6[%9, %42, %c0_i32_25] : memref<2x8x128xf32, #tpu.memory_space<vmem>> -> memref<1x1x128xf32, #tpu.memory_space<vmem>>
      %48 = tpu.memref_squeeze %47 : memref<1x1x128xf32, #tpu.memory_space<vmem>> -> memref<1x128xf32, #tpu.memory_space<vmem>>
      %49 = tpu.memref_slice %arg7[%9] : memref<2x!tpu.dma_semaphore, #tpu.memory_space<semaphore_mem>> -> memref<1x!tpu.dma_semaphore, #tpu.memory_space<semaphore_mem>>
      %50 = tpu.memref_squeeze %49 : memref<1x!tpu.dma_semaphore, #tpu.memory_space<semaphore_mem>> -> memref<!tpu.dma_semaphore, #tpu.memory_space<semaphore_mem>>
      tpu.enqueue_dma source(%46 : memref<1x128xf32, #tpu.memory_space<any>>) target(%48 : memref<1x128xf32, #tpu.memory_space<vmem>>) target_semaphore(%50 : memref<!tpu.dma_semaphore, #tpu.memory_space<semaphore_mem>>)
      %c2_i32_26 = arith.constant 2 : i32
      %51 = arith.addi %32, %c2_i32_26 : i32
      %52 = arith.addi %30, %51 : i32
      %53 = arith.index_cast %52 : i32 to index
      %54 = memref.load %arg2[%53] : memref<16xi32, #tpu.memory_space<smem>>
      %c0_i32_27 = arith.constant 0 : i32
      %55 = tpu.memref_slice %arg3[%54, %c0_i32_27] : memref<64x128xf32, #tpu.memory_space<any>> -> memref<1x128xf32, #tpu.memory_space<any>>
      %c0_i32_28 = arith.constant 0 : i32
      %56 = tpu.memref_slice %arg6[%9, %51, %c0_i32_28] : memref<2x8x128xf32, #tpu.memory_space<vmem>> -> memref<1x1x128xf32, #tpu.memory_space<vmem>>
      %57 = tpu.memref_squeeze %56 : memref<1x1x128xf32, #tpu.memory_space<vmem>> -> memref<1x128xf32, #tpu.memory_space<vmem>>
      %58 = tpu.memref_slice %arg7[%9] : memref<2x!tpu.dma_semaphore, #tpu.memory_space<semaphore_mem>> -> memref<1x!tpu.dma_semaphore, #tpu.memory_space<semaphore_mem>>
      %59 = tpu.memref_squeeze %58 : memref<1x!tpu.dma_semaphore, #tpu.memory_space<semaphore_mem>> -> memref<!tpu.dma_semaphore, #tpu.memory_space<semaphore_mem>>
      tpu.enqueue_dma source(%55 : memref<1x128xf32, #tpu.memory_space<any>>) target(%57 : memref<1x128xf32, #tpu.memory_space<vmem>>) target_semaphore(%59 : memref<!tpu.dma_semaphore, #tpu.memory_space<semaphore_mem>>)
      %c3_i32 = arith.constant 3 : i32
      %60 = arith.addi %32, %c3_i32 : i32
      %61 = arith.addi %30, %60 : i32
      %62 = arith.index_cast %61 : i32 to index
      %63 = memref.load %arg2[%62] : memref<16xi32, #tpu.memory_space<smem>>
      %c0_i32_29 = arith.constant 0 : i32
      %64 = tpu.memref_slice %arg3[%63, %c0_i32_29] : memref<64x128xf32, #tpu.memory_space<any>> -> memref<1x128xf32, #tpu.memory_space<any>>
      %c0_i32_30 = arith.constant 0 : i32
      %65 = tpu.memref_slice %arg6[%9, %60, %c0_i32_30] : memref<2x8x128xf32, #tpu.memory_space<vmem>> -> memref<1x1x128xf32, #tpu.memory_space<vmem>>
      %66 = tpu.memref_squeeze %65 : memref<1x1x128xf32, #tpu.memory_space<vmem>> -> memref<1x128xf32, #tpu.memory_space<vmem>>
      %67 = tpu.memref_slice %arg7[%9] : memref<2x!tpu.dma_semaphore, #tpu.memory_space<semaphore_mem>> -> memref<1x!tpu.dma_semaphore, #tpu.memory_space<semaphore_mem>>
      %68 = tpu.memref_squeeze %67 : memref<1x!tpu.dma_semaphore, #tpu.memory_space<semaphore_mem>> -> memref<!tpu.dma_semaphore, #tpu.memory_space<semaphore_mem>>
      tpu.enqueue_dma source(%64 : memref<1x128xf32, #tpu.memory_space<any>>) target(%66 : memref<1x128xf32, #tpu.memory_space<vmem>>) target_semaphore(%68 : memref<!tpu.dma_semaphore, #tpu.memory_space<semaphore_mem>>)
      %c4_i32 = arith.constant 4 : i32
      %69 = arith.addi %32, %c4_i32 : i32
      %70 = arith.addi %30, %69 : i32
      %71 = arith.index_cast %70 : i32 to index
      %72 = memref.load %arg2[%71] : memref<16xi32, #tpu.memory_space<smem>>
      %c0_i32_31 = arith.constant 0 : i32
      %73 = tpu.memref_slice %arg3[%72, %c0_i32_31] : memref<64x128xf32, #tpu.memory_space<any>> -> memref<1x128xf32, #tpu.memory_space<any>>
      %c0_i32_32 = arith.constant 0 : i32
      %74 = tpu.memref_slice %arg6[%9, %69, %c0_i32_32] : memref<2x8x128xf32, #tpu.memory_space<vmem>> -> memref<1x1x128xf32, #tpu.memory_space<vmem>>
      %75 = tpu.memref_squeeze %74 : memref<1x1x128xf32, #tpu.memory_space<vmem>> -> memref<1x128xf32, #tpu.memory_space<vmem>>
      %76 = tpu.memref_slice %arg7[%9] : memref<2x!tpu.dma_semaphore, #tpu.memory_space<semaphore_mem>> -> memref<1x!tpu.dma_semaphore, #tpu.memory_space<semaphore_mem>>
      %77 = tpu.memref_squeeze %76 : memref<1x!tpu.dma_semaphore, #tpu.memory_space<semaphore_mem>> -> memref<!tpu.dma_semaphore, #tpu.memory_space<semaphore_mem>>
      tpu.enqueue_dma source(%73 : memref<1x128xf32, #tpu.memory_space<any>>) target(%75 : memref<1x128xf32, #tpu.memory_space<vmem>>) target_semaphore(%77 : memref<!tpu.dma_semaphore, #tpu.memory_space<semaphore_mem>>)
      %c5_i32 = arith.constant 5 : i32
      %78 = arith.addi %32, %c5_i32 : i32
      %79 = arith.addi %30, %78 : i32
      %80 = arith.index_cast %79 : i32 to index
      %81 = memref.load %arg2[%80] : memref<16xi32, #tpu.memory_space<smem>>
      %c0_i32_33 = arith.constant 0 : i32
      %82 = tpu.memref_slice %arg3[%81, %c0_i32_33] : memref<64x128xf32, #tpu.memory_space<any>> -> memref<1x128xf32, #tpu.memory_space<any>>
      %c0_i32_34 = arith.constant 0 : i32
      %83 = tpu.memref_slice %arg6[%9, %78, %c0_i32_34] : memref<2x8x128xf32, #tpu.memory_space<vmem>> -> memref<1x1x128xf32, #tpu.memory_space<vmem>>
      %84 = tpu.memref_squeeze %83 : memref<1x1x128xf32, #tpu.memory_space<vmem>> -> memref<1x128xf32, #tpu.memory_space<vmem>>
      %85 = tpu.memref_slice %arg7[%9] : memref<2x!tpu.dma_semaphore, #tpu.memory_space<semaphore_mem>> -> memref<1x!tpu.dma_semaphore, #tpu.memory_space<semaphore_mem>>
      %86 = tpu.memref_squeeze %85 : memref<1x!tpu.dma_semaphore, #tpu.memory_space<semaphore_mem>> -> memref<!tpu.dma_semaphore, #tpu.memory_space<semaphore_mem>>
      tpu.enqueue_dma source(%82 : memref<1x128xf32, #tpu.memory_space<any>>) target(%84 : memref<1x128xf32, #tpu.memory_space<vmem>>) target_semaphore(%86 : memref<!tpu.dma_semaphore, #tpu.memory_space<semaphore_mem>>)
      %c6_i32 = arith.constant 6 : i32
      %87 = arith.addi %32, %c6_i32 : i32
      %88 = arith.addi %30, %87 : i32
      %89 = arith.index_cast %88 : i32 to index
      %90 = memref.load %arg2[%89] : memref<16xi32, #tpu.memory_space<smem>>
      %c0_i32_35 = arith.constant 0 : i32
      %91 = tpu.memref_slice %arg3[%90, %c0_i32_35] : memref<64x128xf32, #tpu.memory_space<any>> -> memref<1x128xf32, #tpu.memory_space<any>>
      %c0_i32_36 = arith.constant 0 : i32
      %92 = tpu.memref_slice %arg6[%9, %87, %c0_i32_36] : memref<2x8x128xf32, #tpu.memory_space<vmem>> -> memref<1x1x128xf32, #tpu.memory_space<vmem>>
      %93 = tpu.memref_squeeze %92 : memref<1x1x128xf32, #tpu.memory_space<vmem>> -> memref<1x128xf32, #tpu.memory_space<vmem>>
      %94 = tpu.memref_slice %arg7[%9] : memref<2x!tpu.dma_semaphore, #tpu.memory_space<semaphore_mem>> -> memref<1x!tpu.dma_semaphore, #tpu.memory_space<semaphore_mem>>
      %95 = tpu.memref_squeeze %94 : memref<1x!tpu.dma_semaphore, #tpu.memory_space<semaphore_mem>> -> memref<!tpu.dma_semaphore, #tpu.memory_space<semaphore_mem>>
      tpu.enqueue_dma source(%91 : memref<1x128xf32, #tpu.memory_space<any>>) target(%93 : memref<1x128xf32, #tpu.memory_space<vmem>>) target_semaphore(%95 : memref<!tpu.dma_semaphore, #tpu.memory_space<semaphore_mem>>)
      %c7_i32 = arith.constant 7 : i32
      %96 = arith.addi %32, %c7_i32 : i32
      %97 = arith.addi %30, %96 : i32
      %98 = arith.index_cast %97 : i32 to index
      %99 = memref.load %arg2[%98] : memref<16xi32, #tpu.memory_space<smem>>
      %c0_i32_37 = arith.constant 0 : i32
      %100 = tpu.memref_slice %arg3[%99, %c0_i32_37] : memref<64x128xf32, #tpu.memory_space<any>> -> memref<1x128xf32, #tpu.memory_space<any>>
      %c0_i32_38 = arith.constant 0 : i32
      %101 = tpu.memref_slice %arg6[%9, %96, %c0_i32_38] : memref<2x8x128xf32, #tpu.memory_space<vmem>> -> memref<1x1x128xf32, #tpu.memory_space<vmem>>
      %102 = tpu.memref_squeeze %101 : memref<1x1x128xf32, #tpu.memory_space<vmem>> -> memref<1x128xf32, #tpu.memory_space<vmem>>
      %103 = tpu.memref_slice %arg7[%9] : memref<2x!tpu.dma_semaphore, #tpu.memory_space<semaphore_mem>> -> memref<1x!tpu.dma_semaphore, #tpu.memory_space<semaphore_mem>>
      %104 = tpu.memref_squeeze %103 : memref<1x!tpu.dma_semaphore, #tpu.memory_space<semaphore_mem>> -> memref<!tpu.dma_semaphore, #tpu.memory_space<semaphore_mem>>
      tpu.enqueue_dma source(%100 : memref<1x128xf32, #tpu.memory_space<any>>) target(%102 : memref<1x128xf32, #tpu.memory_space<vmem>>) target_semaphore(%104 : memref<!tpu.dma_semaphore, #tpu.memory_space<semaphore_mem>>)
      %c1_i32_39 = arith.constant 1 : i32
    } else {
    }
    %c1_i32_5 = arith.constant 1 : i32
    %13 = arith.addi %arg1, %c1_i32_5 : i32
    %c1_i32_6 = arith.constant 1 : i32
    %14 = arith.cmpi slt, %13, %c1_i32_6 : i32
    %15 = arith.extui %14 : i1 to i32
    %c0_i32_7 = arith.constant 0 : i32
    %16 = arith.cmpi ne, %15, %c0_i32_7 : i32
    scf.if %16 {
      %c1_i32_17 = arith.constant 1 : i32
      %29 = arith.addi %arg1, %c1_i32_17 : i32
      %c1_i32_18 = arith.constant 1 : i32
      %30 = arith.subi %c1_i32_18, %9 : i32
      %c8_i32 = arith.constant 8 : i32
      %31 = arith.muli %arg0, %c8_i32 : i32
      %c8_i32_19 = arith.constant 8 : i32
      %32 = arith.muli %29, %c8_i32_19 : i32
      %33 = arith.addi %31, %32 : i32
      %c0_i32_20 = arith.constant 0 : i32
      %c8_i32_21 = arith.constant 8 : i32
      %34 = arith.muli %c0_i32_20, %c8_i32_21 : i32
      %35 = tpu.assume_multiple %34, 8 : i32
      %c0_i32_22 = arith.constant 0 : i32
      %36 = arith.addi %35, %c0_i32_22 : i32
      %37 = arith.addi %33, %36 : i32
      %38 = arith.index_cast %37 : i32 to index
      %39 = memref.load %arg2[%38] : memref<16xi32, #tpu.memory_space<smem>>
      %c0_i32_23 = arith.constant 0 : i32
      %40 = tpu.memref_slice %arg3[%39, %c0_i32_23] : memref<64x128xf32, #tpu.memory_space<any>> -> memref<1x128xf32, #tpu.memory_space<any>>
      %c0_i32_24 = arith.constant 0 : i32
      %41 = tpu.memref_slice %arg6[%30, %36, %c0_i32_24] : memref<2x8x128xf32, #tpu.memory_space<vmem>> -> memref<1x1x128xf32, #tpu.memory_space<vmem>>
      %42 = tpu.memref_squeeze %41 : memref<1x1x128xf32, #tpu.memory_space<vmem>> -> memref<1x128xf32, #tpu.memory_space<vmem>>
      %43 = tpu.memref_slice %arg7[%30] : memref<2x!tpu.dma_semaphore, #tpu.memory_space<semaphore_mem>> -> memref<1x!tpu.dma_semaphore, #tpu.memory_space<semaphore_mem>>
      %44 = tpu.memref_squeeze %43 : memref<1x!tpu.dma_semaphore, #tpu.memory_space<semaphore_mem>> -> memref<!tpu.dma_semaphore, #tpu.memory_space<semaphore_mem>>
      tpu.enqueue_dma source(%40 : memref<1x128xf32, #tpu.memory_space<any>>) target(%42 : memref<1x128xf32, #tpu.memory_space<vmem>>) target_semaphore(%44 : memref<!tpu.dma_semaphore, #tpu.memory_space<semaphore_mem>>)
      %c1_i32_25 = arith.constant 1 : i32
      %45 = arith.addi %35, %c1_i32_25 : i32
      %46 = arith.addi %33, %45 : i32
      %47 = arith.index_cast %46 : i32 to index
      %48 = memref.load %arg2[%47] : memref<16xi32, #tpu.memory_space<smem>>
      %c0_i32_26 = arith.constant 0 : i32
      %49 = tpu.memref_slice %arg3[%48, %c0_i32_26] : memref<64x128xf32, #tpu.memory_space<any>> -> memref<1x128xf32, #tpu.memory_space<any>>
      %c0_i32_27 = arith.constant 0 : i32
      %50 = tpu.memref_slice %arg6[%30, %45, %c0_i32_27] : memref<2x8x128xf32, #tpu.memory_space<vmem>> -> memref<1x1x128xf32, #tpu.memory_space<vmem>>
      %51 = tpu.memref_squeeze %50 : memref<1x1x128xf32, #tpu.memory_space<vmem>> -> memref<1x128xf32, #tpu.memory_space<vmem>>
      %52 = tpu.memref_slice %arg7[%30] : memref<2x!tpu.dma_semaphore, #tpu.memory_space<semaphore_mem>> -> memref<1x!tpu.dma_semaphore, #tpu.memory_space<semaphore_mem>>
      %53 = tpu.memref_squeeze %52 : memref<1x!tpu.dma_semaphore, #tpu.memory_space<semaphore_mem>> -> memref<!tpu.dma_semaphore, #tpu.memory_space<semaphore_mem>>
      tpu.enqueue_dma source(%49 : memref<1x128xf32, #tpu.memory_space<any>>) target(%51 : memref<1x128xf32, #tpu.memory_space<vmem>>) target_semaphore(%53 : memref<!tpu.dma_semaphore, #tpu.memory_space<semaphore_mem>>)
      %c2_i32_28 = arith.constant 2 : i32
      %54 = arith.addi %35, %c2_i32_28 : i32
      %55 = arith.addi %33, %54 : i32
      %56 = arith.index_cast %55 : i32 to index
      %57 = memref.load %arg2[%56] : memref<16xi32, #tpu.memory_space<smem>>
      %c0_i32_29 = arith.constant 0 : i32
      %58 = tpu.memref_slice %arg3[%57, %c0_i32_29] : memref<64x128xf32, #tpu.memory_space<any>> -> memref<1x128xf32, #tpu.memory_space<any>>
      %c0_i32_30 = arith.constant 0 : i32
      %59 = tpu.memref_slice %arg6[%30, %54, %c0_i32_30] : memref<2x8x128xf32, #tpu.memory_space<vmem>> -> memref<1x1x128xf32, #tpu.memory_space<vmem>>
      %60 = tpu.memref_squeeze %59 : memref<1x1x128xf32, #tpu.memory_space<vmem>> -> memref<1x128xf32, #tpu.memory_space<vmem>>
      %61 = tpu.memref_slice %arg7[%30] : memref<2x!tpu.dma_semaphore, #tpu.memory_space<semaphore_mem>> -> memref<1x!tpu.dma_semaphore, #tpu.memory_space<semaphore_mem>>
      %62 = tpu.memref_squeeze %61 : memref<1x!tpu.dma_semaphore, #tpu.memory_space<semaphore_mem>> -> memref<!tpu.dma_semaphore, #tpu.memory_space<semaphore_mem>>
      tpu.enqueue_dma source(%58 : memref<1x128xf32, #tpu.memory_space<any>>) target(%60 : memref<1x128xf32, #tpu.memory_space<vmem>>) target_semaphore(%62 : memref<!tpu.dma_semaphore, #tpu.memory_space<semaphore_mem>>)
      %c3_i32 = arith.constant 3 : i32
      %63 = arith.addi %35, %c3_i32 : i32
      %64 = arith.addi %33, %63 : i32
      %65 = arith.index_cast %64 : i32 to index
      %66 = memref.load %arg2[%65] : memref<16xi32, #tpu.memory_space<smem>>
      %c0_i32_31 = arith.constant 0 : i32
      %67 = tpu.memref_slice %arg3[%66, %c0_i32_31] : memref<64x128xf32, #tpu.memory_space<any>> -> memref<1x128xf32, #tpu.memory_space<any>>
      %c0_i32_32 = arith.constant 0 : i32
      %68 = tpu.memref_slice %arg6[%30, %63, %c0_i32_32] : memref<2x8x128xf32, #tpu.memory_space<vmem>> -> memref<1x1x128xf32, #tpu.memory_space<vmem>>
      %69 = tpu.memref_squeeze %68 : memref<1x1x128xf32, #tpu.memory_space<vmem>> -> memref<1x128xf32, #tpu.memory_space<vmem>>
      %70 = tpu.memref_slice %arg7[%30] : memref<2x!tpu.dma_semaphore, #tpu.memory_space<semaphore_mem>> -> memref<1x!tpu.dma_semaphore, #tpu.memory_space<semaphore_mem>>
      %71 = tpu.memref_squeeze %70 : memref<1x!tpu.dma_semaphore, #tpu.memory_space<semaphore_mem>> -> memref<!tpu.dma_semaphore, #tpu.memory_space<semaphore_mem>>
      tpu.enqueue_dma source(%67 : memref<1x128xf32, #tpu.memory_space<any>>) target(%69 : memref<1x128xf32, #tpu.memory_space<vmem>>) target_semaphore(%71 : memref<!tpu.dma_semaphore, #tpu.memory_space<semaphore_mem>>)
      %c4_i32 = arith.constant 4 : i32
      %72 = arith.addi %35, %c4_i32 : i32
      %73 = arith.addi %33, %72 : i32
      %74 = arith.index_cast %73 : i32 to index
      %75 = memref.load %arg2[%74] : memref<16xi32, #tpu.memory_space<smem>>
      %c0_i32_33 = arith.constant 0 : i32
      %76 = tpu.memref_slice %arg3[%75, %c0_i32_33] : memref<64x128xf32, #tpu.memory_space<any>> -> memref<1x128xf32, #tpu.memory_space<any>>
      %c0_i32_34 = arith.constant 0 : i32
      %77 = tpu.memref_slice %arg6[%30, %72, %c0_i32_34] : memref<2x8x128xf32, #tpu.memory_space<vmem>> -> memref<1x1x128xf32, #tpu.memory_space<vmem>>
      %78 = tpu.memref_squeeze %77 : memref<1x1x128xf32, #tpu.memory_space<vmem>> -> memref<1x128xf32, #tpu.memory_space<vmem>>
      %79 = tpu.memref_slice %arg7[%30] : memref<2x!tpu.dma_semaphore, #tpu.memory_space<semaphore_mem>> -> memref<1x!tpu.dma_semaphore, #tpu.memory_space<semaphore_mem>>
      %80 = tpu.memref_squeeze %79 : memref<1x!tpu.dma_semaphore, #tpu.memory_space<semaphore_mem>> -> memref<!tpu.dma_semaphore, #tpu.memory_space<semaphore_mem>>
      tpu.enqueue_dma source(%76 : memref<1x128xf32, #tpu.memory_space<any>>) target(%78 : memref<1x128xf32, #tpu.memory_space<vmem>>) target_semaphore(%80 : memref<!tpu.dma_semaphore, #tpu.memory_space<semaphore_mem>>)
      %c5_i32 = arith.constant 5 : i32
      %81 = arith.addi %35, %c5_i32 : i32
      %82 = arith.addi %33, %81 : i32
      %83 = arith.index_cast %82 : i32 to index
      %84 = memref.load %arg2[%83] : memref<16xi32, #tpu.memory_space<smem>>
      %c0_i32_35 = arith.constant 0 : i32
      %85 = tpu.memref_slice %arg3[%84, %c0_i32_35] : memref<64x128xf32, #tpu.memory_space<any>> -> memref<1x128xf32, #tpu.memory_space<any>>
      %c0_i32_36 = arith.constant 0 : i32
      %86 = tpu.memref_slice %arg6[%30, %81, %c0_i32_36] : memref<2x8x128xf32, #tpu.memory_space<vmem>> -> memref<1x1x128xf32, #tpu.memory_space<vmem>>
      %87 = tpu.memref_squeeze %86 : memref<1x1x128xf32, #tpu.memory_space<vmem>> -> memref<1x128xf32, #tpu.memory_space<vmem>>
      %88 = tpu.memref_slice %arg7[%30] : memref<2x!tpu.dma_semaphore, #tpu.memory_space<semaphore_mem>> -> memref<1x!tpu.dma_semaphore, #tpu.memory_space<semaphore_mem>>
      %89 = tpu.memref_squeeze %88 : memref<1x!tpu.dma_semaphore, #tpu.memory_space<semaphore_mem>> -> memref<!tpu.dma_semaphore, #tpu.memory_space<semaphore_mem>>
      tpu.enqueue_dma source(%85 : memref<1x128xf32, #tpu.memory_space<any>>) target(%87 : memref<1x128xf32, #tpu.memory_space<vmem>>) target_semaphore(%89 : memref<!tpu.dma_semaphore, #tpu.memory_space<semaphore_mem>>)
      %c6_i32 = arith.constant 6 : i32
      %90 = arith.addi %35, %c6_i32 : i32
      %91 = arith.addi %33, %90 : i32
      %92 = arith.index_cast %91 : i32 to index
      %93 = memref.load %arg2[%92] : memref<16xi32, #tpu.memory_space<smem>>
      %c0_i32_37 = arith.constant 0 : i32
      %94 = tpu.memref_slice %arg3[%93, %c0_i32_37] : memref<64x128xf32, #tpu.memory_space<any>> -> memref<1x128xf32, #tpu.memory_space<any>>
      %c0_i32_38 = arith.constant 0 : i32
      %95 = tpu.memref_slice %arg6[%30, %90, %c0_i32_38] : memref<2x8x128xf32, #tpu.memory_space<vmem>> -> memref<1x1x128xf32, #tpu.memory_space<vmem>>
      %96 = tpu.memref_squeeze %95 : memref<1x1x128xf32, #tpu.memory_space<vmem>> -> memref<1x128xf32, #tpu.memory_space<vmem>>
      %97 = tpu.memref_slice %arg7[%30] : memref<2x!tpu.dma_semaphore, #tpu.memory_space<semaphore_mem>> -> memref<1x!tpu.dma_semaphore, #tpu.memory_space<semaphore_mem>>
      %98 = tpu.memref_squeeze %97 : memref<1x!tpu.dma_semaphore, #tpu.memory_space<semaphore_mem>> -> memref<!tpu.dma_semaphore, #tpu.memory_space<semaphore_mem>>
      tpu.enqueue_dma source(%94 : memref<1x128xf32, #tpu.memory_space<any>>) target(%96 : memref<1x128xf32, #tpu.memory_space<vmem>>) target_semaphore(%98 : memref<!tpu.dma_semaphore, #tpu.memory_space<semaphore_mem>>)
      %c7_i32 = arith.constant 7 : i32
      %99 = arith.addi %35, %c7_i32 : i32
      %100 = arith.addi %33, %99 : i32
      %101 = arith.index_cast %100 : i32 to index
      %102 = memref.load %arg2[%101] : memref<16xi32, #tpu.memory_space<smem>>
      %c0_i32_39 = arith.constant 0 : i32
      %103 = tpu.memref_slice %arg3[%102, %c0_i32_39] : memref<64x128xf32, #tpu.memory_space<any>> -> memref<1x128xf32, #tpu.memory_space<any>>
      %c0_i32_40 = arith.constant 0 : i32
      %104 = tpu.memref_slice %arg6[%30, %99, %c0_i32_40] : memref<2x8x128xf32, #tpu.memory_space<vmem>> -> memref<1x1x128xf32, #tpu.memory_space<vmem>>
      %105 = tpu.memref_squeeze %104 : memref<1x1x128xf32, #tpu.memory_space<vmem>> -> memref<1x128xf32, #tpu.memory_space<vmem>>
      %106 = tpu.memref_slice %arg7[%30] : memref<2x!tpu.dma_semaphore, #tpu.memory_space<semaphore_mem>> -> memref<1x!tpu.dma_semaphore, #tpu.memory_space<semaphore_mem>>
      %107 = tpu.memref_squeeze %106 : memref<1x!tpu.dma_semaphore, #tpu.memory_space<semaphore_mem>> -> memref<!tpu.dma_semaphore, #tpu.memory_space<semaphore_mem>>
      tpu.enqueue_dma source(%103 : memref<1x128xf32, #tpu.memory_space<any>>) target(%105 : memref<1x128xf32, #tpu.memory_space<vmem>>) target_semaphore(%107 : memref<!tpu.dma_semaphore, #tpu.memory_space<semaphore_mem>>)
      %c1_i32_41 = arith.constant 1 : i32
    } else {
    }
    %c0_i32_8 = arith.constant 0 : i32
    %c0_i32_9 = arith.constant 0 : i32
    %17 = tpu.memref_slice %arg6[%9, %c0_i32_8, %c0_i32_9] : memref<2x8x128xf32, #tpu.memory_space<vmem>> -> memref<1x8x128xf32, #tpu.memory_space<vmem>>
    %18 = tpu.memref_squeeze %17 : memref<1x8x128xf32, #tpu.memory_space<vmem>> -> memref<8x128xf32, #tpu.memory_space<vmem>>
    %c0_i32_10 = arith.constant 0 : i32
    %c0_i32_11 = arith.constant 0 : i32
    %19 = tpu.memref_slice %arg6[%9, %c0_i32_10, %c0_i32_11] : memref<2x8x128xf32, #tpu.memory_space<vmem>> -> memref<1x8x128xf32, #tpu.memory_space<vmem>>
    %20 = tpu.memref_squeeze %19 : memref<1x8x128xf32, #tpu.memory_space<vmem>> -> memref<8x128xf32, #tpu.memory_space<vmem>>
    %21 = tpu.memref_slice %arg7[%9] : memref<2x!tpu.dma_semaphore, #tpu.memory_space<semaphore_mem>> -> memref<1x!tpu.dma_semaphore, #tpu.memory_space<semaphore_mem>>
    %22 = tpu.memref_squeeze %21 : memref<1x!tpu.dma_semaphore, #tpu.memory_space<semaphore_mem>> -> memref<!tpu.dma_semaphore, #tpu.memory_space<semaphore_mem>>
    tpu.wait_dma2 semaphore(%22 : memref<!tpu.dma_semaphore, #tpu.memory_space<semaphore_mem>>) src(%18 : memref<8x128xf32, #tpu.memory_space<vmem>>) dst(%20 : memref<8x128xf32, #tpu.memory_space<vmem>>)
    %23 = arith.index_cast %9 : i32 to index
    %c0 = arith.constant 0 : index
    %c0_12 = arith.constant 0 : index
    %24 = vector.load %arg6[%23, %c0, %c0_12] : memref<2x8x128xf32, #tpu.memory_space<vmem>>, vector<1x8x128xf32>
    %25 = vector.shape_cast %24 : vector<1x8x128xf32> to vector<8x128xf32>
    %c0_13 = arith.constant 0 : index
    %c0_14 = arith.constant 0 : index
    %26 = vector.load %arg4[%c0_13, %c0_14] : memref<8x128xf32, #tpu.memory_space<vmem>>, vector<8x128xf32>
    %27 = arith.addf %25, %26 : vector<8x128xf32>
    %c0_15 = arith.constant 0 : index
    %c0_16 = arith.constant 0 : index
    %28 = vector.load %arg5[%c0_15, %c0_16] : memref<8x128xf32, #tpu.memory_space<vmem>>, vector<8x128xf32>
    tpu.vector_store %arg5[%c0_15, %c0_16], %27 {strides = array<i32>} : memref<8x128xf32, #tpu.memory_space<vmem>>, vector<8x128xf32>,
    return
  }
  func.func @transform_1(%arg0: i32, %arg1: i32, %arg2: memref<16xi32, #tpu.memory_space<smem>>) -> (i32, i32) {
    %c0_i32 = arith.constant 0 : i32
    %c0_i32_0 = arith.constant 0 : i32
    return %arg1, %c0_i32 : i32, i32
  }
  func.func @transform_2(%arg0: i32, %arg1: i32, %arg2: memref<16xi32, #tpu.memory_space<smem>>) -> (i32, i32) {
    %c1_i32 = arith.constant 1 : i32
    %0 = arith.muli %arg0, %c1_i32 : i32
    %1 = arith.addi %0, %arg1 : i32
    %c0_i32 = arith.constant 0 : i32
    %c0_i32_0 = arith.constant 0 : i32
    return %1, %c0_i32 : i32, i32
  }
}

</mosaic_0001>

<bundles_post_ra>
// kernel: tpu_custom_call.1
= control target key start
LH: loop header
LB: loop body
LE: loop exit
PB: predicated region body
PF: predicated region fallthrough
CT: control target
= control target key end

     0   :  { %s1045_s12 = smov [#allocation5]   ;;  %s1326_s0 = inlined_call_operand.hbm [shape: s32[16], index: 0, kind: input, shape index: {}]   ;;  %s1327_s1 = inlined_call_operand.hbm [shape: f32[64,128], index: 1, kind: input, shape index: {}]   ;;  %s1328_s2 = inlined_call_operand.hbm [shape: f32[8,128], index: 2, kind: input, shape index: {}]   ;;  %s1329_s3 = inlined_call_operand.hbm [shape: f32[16,128], index: 3, kind: output, shape index: {}]  }
   0x1   :  { %1333 = sst [smem:[#allocation51_spill]] %s1328_s2 }
   0x2   :  { %9 = dma.hbm_to_smem %s1326_s0, 16, %s1045_s12, [#allocation4] }
   0x3   :  { %1009 = dma.done.wait [#allocation4], 16 }
   0x4   :  { %1010 = vsyncadd [#allocation4], 4294967280 }
   0x5   :  { %11 = sfence }
   0x6   :  { %12 = vsyncpa [#allocation7], 0 }
   0x7   :  { %13 = vsyncpa [#allocation8], 0 }
   0x8   :  { %15 = vsyncpa [#allocation8 + $0x1], 0  ;;  %s1072_s15 = smov 0   ;;  %s1074_s16 = smov 0  }
   0x9   :  { %s1076_s17 = smov 0   ;;  %s1078_s18 = smov 0  }
   0xa   :  { %s1080_s19 = smov 0   ;;  %s1082_s20 = smov 0  }
   0xb LB: > { %1334 = sst [smem:[#allocation48_spill]] %s1039_s19  ;;  %s643_s0 = sadd.s32 4294967295, %s1043_s20   ;;  %s1043_s20 = sphi %s1082_s20, %s21_s20   ;;  %s1039_s19 = sphi %s1080_s19, %s1345_s19   ;;  %s1035_s18 = sphi %s1078_s18, %s1344_s18   ;;  %s1031_s17 = sphi %s1076_s17, %s1348_s17   ;;  %s1027_s16 = sphi %s1074_s16, %s1347_s16   ;;  %s1023_s15 = sphi %s1072_s15, %s1346_s15  }
   0xc   : > { %s644_s21 = sadd.s32 4294967294, %s1043_s20   ;;  %s33_s22 = sadd.s32 1, %s1039_s19 }
   0xd   : > { %s68_s23 = sadd.s32 1, %s1031_s17  ;;  %p35_p0 = scmp.ge.s32.totalorder %s33_s22, 2 }
   0xe   : > { %p78_p1 = scmp.ne.s32.totalorder %s1031_s17, %s1027_s16  ;;  %p79_p2 = scmp.eq.s32.totalorder %s643_s0, 1 }
   0xf   : > { %p84_p3 = scmp.ne.s32.totalorder %s1027_s16, %s1023_s15  ;;  %s1350_s22 = smov (%p35_p0, %s33_s22), 0 }
  0x10   : > { %1335 = sst [smem:[#allocation49_spill]] %s1350_s22  ;;  %p1112_p4 = por %p79_p2, %p78_p1 }
  0x11   : > { %p85_p5 = scmp.eq.s32.totalorder %s644_s21, 1  ;;  %s65_s25 = ssub.s32 %s1039_s19, %s1350_s22 }
  0x12   : > { %p645_p6 = scmp.ge.s32.totalorder %s1043_s20, 1  ;;  %p66_p7 = scmp.eq.s32.totalorder %s65_s25, 0 }
  0x13   : > { %p1119_p8 = por %p85_p5, %p84_p3  ;;  %p92_p9 = scmp.lt.s32.totalorder %s1043_s20, 3 }
  0x14   : > { %s1125_s27 = scalar_select %p66_p7, %s1031_s17, %s68_s23  }
  0x15   : > { %p1127_p10 = pnand %p645_p6, %p92_p9  ;;  %p1131_p11 = scmp.eq.s32.totalorder %s643_s0, 0 }
  0x16   : > { %1338 = sst [smem:[#allocation50_spill]] %s1125_s27  ;;  %s1046_s30 = smov [#allocation6]  }
  0x17   : > { %p687_p12 = pneg %p1127_p10  ;;  %s107_s4 = sshll.u32 %s1046_s30, 4  ;;  %s108_s4 = int_to_ptr.vmem [resolvable:$true] %s107_s4 }
  0x18   : > { %s768_s5 = scalar_lea.vmem %s108_s4, 128  ;;  %p776_p5 = scmp.lt.s32.totalorder %s108_s4, %s108_s4 }
  0x19   : > { %p688_p13 = pnand %p1131_p11, %p687_p12  ;;  %p769_p1 = scmp.ne.s32.totalorder %s108_s4, %s768_s5 }
  0x1a   : > { %p777_p6 = scmp.lt.s32.totalorder %s768_s5, %s768_s5 }
  0x1b   : > { %p759_p0 = pneg %p688_p13 }
  0x1c   : > { %p778_p7 = por %p777_p6, %p776_p5 }
  0x1d   : > { %p771_p2 = pnand %p769_p1, %p759_p0 }
  0x1f   : > { %p772_p3 = pneg %p771_p2 }
  0x21   : > { %p779_p9 = pnand %p778_p7, %p772_p3 }
  0x23   : > { %782 = shalt.err (!%p779_p9)
}
  0x24   : > { %s1341_s2 = sld [smem:[#allocation51_spill]] }
  0x26   : > { %120 = sbr.rel (%p1127_p10) target bundleno = 236 (0xec), region = 24 }
  0x2a   : > { %690 = dma.hbm_to_vmem [thread:$0]  (!%p688_p13), %s1341_s2, 128, %s108_s4, [#allocation7]  }
  0x2b   : > { %1012 = dma.done.wait (%p1131_p11), [#allocation7], 128  }
  0x2c   : > { %1014 = vsyncadd (%p1131_p11), [#allocation7], 4294967168  ;;  %s1330_s8 = sand.u32 1, %s1027_s16   ;;  %s1150_s9 = sshll.u32 %s1035_s18, 3 }
  0x2d   : > { %s1154_s10 = sshll.u32 %s1330_s8, 3  ;;  %s154_s11 = sld [smem:[#allocation5 + %s1150_s9]] }
  0x2e   : > { %s1047_s12 = smov [#allocation2]   ;;  %s173_s14 = sadd.s32 1, %s1150_s9 }
  0x2f   : > { %s168_s13 = sshll.u32 %s1047_s12, 4  ;;  %s1161_s0 = sld [smem:[#allocation5 + %s173_s14]]  ;;  %s1159_s13 = int_to_ptr.vmem [resolvable:$true] %s168_s13 }
  0x30   : > { %s528_s21 = scalar_lea.vmem %s1047_s12, 1  ;;  %s191_s23 = sadd.s32 2, %s1150_s9 }
  0x31   : > { %s186_s25 = sshll.u32 %s528_s21, 4  ;;  %s1165_s28 = sld [smem:[#allocation5 + %s191_s23]]  ;;  %s1167_s25 = int_to_ptr.vmem [resolvable:$true] %s186_s25 }
  0x32   : > { %s533_s6 = scalar_lea.vmem %s1047_s12, 2  ;;  %s1176_s2 = scalar_lea.hbm %s1327_s1, 1024 }
  0x33   : > { %s651_s29 = sshll.u32 %s154_s11, 4 }
  0x34   : > { %s156_s5 = scalar_lea.hbm %s1327_s1, %s651_s29 }
  0x35   : > { %s783_s7 = scalar_lea.hbm %s156_s5, 16  ;;  %p786_p11 = scmp.lt.s32.totalorder %s156_s5, %s1327_s1 }
  0x36   : > { %p784_p10 = scmp.ne.s32.totalorder %s156_s5, %s783_s7  ;;  %p787_p12 = scmp.lt.s32.totalorder %s1176_s2, %s783_s7 }
  0x38   : > { %p788_p13 = por %p787_p12, %p786_p11 }
  0x3a   : > { %p789_p0 = pnand %p788_p13, %p784_p10 }
  0x3c   : > { %792 = shalt.err (!%p789_p0)  }
  0x3d   : > { %s793_s11 = scalar_lea.vmem %s1159_s13, 16  ;;  %s1185_s23 = scalar_lea.vmem %s1159_s13, 256 }
  0x3e   : > { %p794_p1 = scmp.ne.s32.totalorder %s1159_s13, %s793_s11  ;;  %p798_p2 = scmp.lt.s32.totalorder %s1159_s13, %s1159_s13 }
  0x3f   : > { %p799_p3 = scmp.lt.s32.totalorder %s1185_s23, %s793_s11 }
  0x41   : > { %p800_p5 = por %p799_p3, %p798_p2 }
  0x43   : > { %p801_p6 = pnand %p800_p5, %p794_p1 }
  0x45   : > { %804 = shalt.err (!%p801_p6)  }
  0x46   : > { %171 = dma.hbm_to_vmem [thread:$0]  %s156_s5, 16, %s1159_s13, [#allocation3] }
  0x47   : > { %s652_s22 = sshll.u32 %s1161_s0, 4  ;;  %s204_s8 = sshll.u32 %s533_s6, 4  ;;  %s1195_s8 = int_to_ptr.vmem [resolvable:$true] %s204_s8 }
  0x48   : > { %s176_s4 = scalar_lea.hbm %s1327_s1, %s652_s22 }
  0x49   : > { %s805_s7 = scalar_lea.hbm %s176_s4, 16  ;;  %p808_p9 = scmp.lt.s32.totalorder %s176_s4, %s1327_s1 }
  0x4a   : > { %p806_p7 = scmp.ne.s32.totalorder %s176_s4, %s805_s7  ;;  %p809_p10 = scmp.lt.s32.totalorder %s1176_s2, %s805_s7 }
  0x4c   : > { %p810_p11 = por %p809_p10, %p808_p9 }
  0x4e   : > { %p811_p12 = pnand %p810_p11, %p806_p7 }
  0x50   : > { %814 = shalt.err (!%p811_p12)  }
  0x51   : > { %s815_s0 = scalar_lea.vmem %s1167_s25, 16  ;;  %p820_p0 = scmp.lt.s32.totalorder %s1167_s25, %s1159_s13 }
  0x52   : > { %p816_p13 = scmp.ne.s32.totalorder %s1167_s25, %s815_s0  ;;  %p821_p1 = scmp.lt.s32.totalorder %s1185_s23, %s815_s0 }
  0x54   : > { %p822_p2 = por %p821_p1, %p820_p0 }
  0x56   : > { %p823_p3 = pnand %p822_p2, %p816_p13 }
  0x58   : > { %826 = shalt.err (!%p823_p3)  }
  0x59   : > { %189 = dma.hbm_to_vmem [thread:$0]  %s176_s4, 16, %s1167_s25, [#allocation3] }
  0x5a   : > { %s653_s5 = sshll.u32 %s1165_s28, 4  ;;  %s209_s6 = sadd.s32 3, %s1150_s9 }
  0x5b   : > { %s194_s29 = scalar_lea.hbm %s1327_s1, %s653_s5  ;;  %s210_s30 = sld [smem:[#allocation5 + %s209_s6]] }
  0x5c   : > { %s827_s7 = scalar_lea.hbm %s194_s29, 16  ;;  %p830_p6 = scmp.lt.s32.totalorder %s194_s29, %s1327_s1 }
  0x5d   : > { %p828_p5 = scmp.ne.s32.totalorder %s194_s29, %s827_s7  ;;  %p831_p7 = scmp.lt.s32.totalorder %s1176_s2, %s827_s7 }
  0x5f   : > { %p832_p9 = por %p831_p7, %p830_p6 }
  0x61   : > { %p833_p10 = pnand %p832_p9, %p828_p5 }
  0x63   : > { %836 = shalt.err (!%p833_p10)  }
  0x64   : > { %s837_s25 = scalar_lea.vmem %s1195_s8, 16  ;;  %p842_p12 = scmp.lt.s32.totalorder %s1195_s8, %s1159_s13 }
  0x65   : > { %p838_p11 = scmp.ne.s32.totalorder %s1195_s8, %s837_s25  ;;  %p843_p13 = scmp.lt.s32.totalorder %s1185_s23, %s837_s25 }
  0x67   : > { %p844_p0 = por %p843_p13, %p842_p12 }
  0x69   : > { %p845_p1 = pnand %p844_p0, %p838_p11 }
  0x6b   : > { %848 = shalt.err (!%p845_p1)  }
  0x6c   : > { %207 = dma.hbm_to_vmem [thread:$0]  %s194_s29, 16, %s1195_s8, [#allocation3] }
  0x6d   : > { %s538_s28 = scalar_lea.vmem %s1047_s12, 3  ;;  %s227_s4 = sadd.s32 4, %s1150_s9 }
  0x6e   : > { %s222_s0 = sshll.u32 %s538_s28, 4  ;;  %s228_s5 = sld [smem:[#allocation5 + %s227_s4]]  ;;  %s223_s0 = int_to_ptr.vmem [resolvable:$true] %s222_s0 }
  0x6f   : > { %s543_s6 = scalar_lea.vmem %s1047_s12, 4  ;;  %s245_s22 = sadd.s32 5, %s1150_s9 }
  0x70   : > { %s240_s11 = sshll.u32 %s543_s6, 4  ;;  %s654_s7 = sshll.u32 %s210_s30, 4  ;;  %s1226_s11 = int_to_ptr.vmem [resolvable:$true] %s240_s11 }
  0x71   : > { %s212_s25 = scalar_lea.hbm %s1327_s1, %s654_s7  ;;  %s1231_s19 = sld [smem:[#allocation5 + %s245_s22]] }
  0x72   : > { %s849_s8 = scalar_lea.hbm %s212_s25, 16  ;;  %p852_p3 = scmp.lt.s32.totalorder %s212_s25, %s1327_s1 }
  0x73   : > { %p850_p2 = scmp.ne.s32.totalorder %s212_s25, %s849_s8  ;;  %p853_p5 = scmp.lt.s32.totalorder %s1176_s2, %s849_s8 }
  0x75   : > { %p854_p6 = por %p853_p5, %p852_p3 }
  0x77   : > { %p855_p7 = pnand %p854_p6, %p850_p2 }
  0x79   : > { %858 = shalt.err (!%p855_p7)  }
  0x7a   : > { %s859_s28 = scalar_lea.vmem %s223_s0, 16  ;;  %p864_p10 = scmp.lt.s32.totalorder %s223_s0, %s1159_s13 }
  0x7b   : > { %p860_p9 = scmp.ne.s32.totalorder %s223_s0, %s859_s28  ;;  %p865_p11 = scmp.lt.s32.totalorder %s1185_s23, %s859_s28 }
  0x7d   : > { %p866_p12 = por %p865_p11, %p864_p10 }
  0x7f   : > { %p867_p13 = pnand %p866_p12, %p860_p9 }
  0x81   : > { %870 = shalt.err (!%p867_p13)  }
  0x82   : > { %225 = dma.hbm_to_vmem [thread:$0]  %s212_s25, 16, %s223_s0, [#allocation3] }
  0x83   : > { %s655_s30 = sshll.u32 %s228_s5, 4  ;;  %s548_s4 = scalar_lea.vmem %s1047_s12, 5 }
  0x84   : > { %s230_s22 = scalar_lea.hbm %s1327_s1, %s655_s30  ;;  %s258_s7 = sshll.u32 %s548_s4, 4  ;;  %s259_s7 = int_to_ptr.vmem [resolvable:$true] %s258_s7 }
  0x85   : > { %s871_s14 = scalar_lea.hbm %s230_s22, 16  ;;  %p874_p1 = scmp.lt.s32.totalorder %s230_s22, %s1327_s1 }
  0x86   : > { %p872_p0 = scmp.ne.s32.totalorder %s230_s22, %s871_s14  ;;  %p875_p2 = scmp.lt.s32.totalorder %s1176_s2, %s871_s14 }
  0x88   : > { %p876_p3 = por %p875_p2, %p874_p1 }
  0x8a   : > { %p877_p5 = pnand %p876_p3, %p872_p0 }
  0x8c   : > { %880 = shalt.err (!%p877_p5)  }
  0x8d   : > { %s881_s0 = scalar_lea.vmem %s1226_s11, 16  ;;  %p886_p7 = scmp.lt.s32.totalorder %s1226_s11, %s1159_s13 }
  0x8e   : > { %p882_p6 = scmp.ne.s32.totalorder %s1226_s11, %s881_s0  ;;  %p887_p9 = scmp.lt.s32.totalorder %s1185_s23, %s881_s0 }
  0x90   : > { %p888_p10 = por %p887_p9, %p886_p7 }
  0x92   : > { %p889_p11 = pnand %p888_p10, %p882_p6 }
  0x94   : > { %892 = shalt.err (!%p889_p11)  }
  0x95   : > { %243 = dma.hbm_to_vmem [thread:$0]  %s230_s22, 16, %s1226_s11, [#allocation3] }
  0x96   : > { %s263_s5 = sadd.s32 6, %s1150_s9  ;;  %s656_s25 = sshll.u32 %s1231_s19, 4 }
  0x97   : > { %s264_s29 = sld [smem:[#allocation5 + %s263_s5]]  ;;  %s248_s4 = scalar_lea.hbm %s1327_s1, %s656_s25 }
  0x98   : > { %s553_s27 = scalar_lea.vmem %s1047_s12, 6  ;;  %s893_s6 = scalar_lea.hbm %s248_s4, 16 }
  0x99   : > { %p894_p12 = scmp.ne.s32.totalorder %s248_s4, %s893_s6  ;;  %p896_p13 = scmp.lt.s32.totalorder %s248_s4, %s1327_s1 }
  0x9a   : > { %p897_p0 = scmp.lt.s32.totalorder %s1176_s2, %s893_s6 }
  0x9c   : > { %p898_p1 = por %p897_p0, %p896_p13 }
  0x9e   : > { %p899_p2 = pnand %p898_p1, %p894_p12 }
  0xa0   : > { %902 = shalt.err (!%p899_p2)  }
  0xa1   : > { %s903_s11 = scalar_lea.vmem %s259_s7, 16  ;;  %p908_p5 = scmp.lt.s32.totalorder %s259_s7, %s1159_s13 }
  0xa2   : > { %p904_p3 = scmp.ne.s32.totalorder %s259_s7, %s903_s11  ;;  %p909_p6 = scmp.lt.s32.totalorder %s1185_s23, %s903_s11 }
  0xa4   : > { %p910_p7 = por %p909_p6, %p908_p5 }
  0xa6   : > { %p911_p9 = pnand %p910_p7, %p904_p3 }
  0xa8   : > { %914 = shalt.err (!%p911_p9)  }
  0xa9   : > { %261 = dma.hbm_to_vmem [thread:$0]  %s248_s4, 16, %s259_s7, [#allocation3] }
  0xaa   : > { %s276_s19 = sshll.u32 %s553_s27, 4  ;;  %s281_s22 = sadd.s32 7, %s1150_s9  ;;  %s277_s19 = int_to_ptr.vmem [resolvable:$true] %s276_s19 }
  0xab   : > { %s282_s8 = sld [smem:[#allocation5 + %s281_s22]]  ;;  %s558_s0 = scalar_lea.vmem %s1047_s12, 7 }
  0xac   : > { %s657_s5 = sshll.u32 %s264_s29, 4  ;;  %s294_s25 = sshll.u32 %s558_s0, 4  ;;  %s295_s25 = int_to_ptr.vmem [resolvable:$true] %s294_s25 }
  0xad   : > { %s266_s6 = scalar_lea.hbm %s1327_s1, %s657_s5 }
  0xae   : > { %s915_s14 = scalar_lea.hbm %s266_s6, 16  ;;  %p918_p11 = scmp.lt.s32.totalorder %s266_s6, %s1327_s1 }
  0xaf   : > { %p916_p10 = scmp.ne.s32.totalorder %s266_s6, %s915_s14  ;;  %p919_p12 = scmp.lt.s32.totalorder %s1176_s2, %s915_s14 }
  0xb1   : > { %p920_p13 = por %p919_p12, %p918_p11 }
  0xb3   : > { %p921_p0 = pnand %p920_p13, %p916_p10 }
  0xb5   : > { %924 = shalt.err (!%p921_p0)  }
  0xb6   : > { %s925_s9 = scalar_lea.vmem %s277_s19, 16  ;;  %p930_p2 = scmp.lt.s32.totalorder %s277_s19, %s1159_s13 }
  0xb7   : > { %p926_p1 = scmp.ne.s32.totalorder %s277_s19, %s925_s9  ;;  %p931_p3 = scmp.lt.s32.totalorder %s1185_s23, %s925_s9 }
  0xb9   : > { %p932_p5 = por %p931_p3, %p930_p2 }
  0xbb   : > { %p933_p6 = pnand %p932_p5, %p926_p1 }
  0xbd   : > { %936 = shalt.err (!%p933_p6)  }
  0xbe   : > { %279 = dma.hbm_to_vmem [thread:$0]  %s266_s6, 16, %s277_s19, [#allocation3] }
  0xbf   : > { %s658_s12 = sshll.u32 %s282_s8, 4 }
  0xc0   : > { %s284_s4 = scalar_lea.hbm %s1327_s1, %s658_s12 }
  0xc1   : > { %s937_s27 = scalar_lea.hbm %s284_s4, 16  ;;  %p940_p9 = scmp.lt.s32.totalorder %s284_s4, %s1327_s1 }
  0xc2   : > { %p938_p7 = scmp.ne.s32.totalorder %s284_s4, %s937_s27  ;;  %p941_p10 = scmp.lt.s32.totalorder %s1176_s2, %s937_s27 }
  0xc4   : > { %p942_p11 = por %p941_p10, %p940_p9 }
  0xc6   : > { %p943_p12 = pnand %p942_p11, %p938_p7 }
  0xc8   : > { %946 = shalt.err (!%p943_p12)  }
  0xc9   : > { %s947_s5 = scalar_lea.vmem %s295_s25, 16  ;;  %p952_p0 = scmp.lt.s32.totalorder %s295_s25, %s1159_s13 }
  0xca   : > { %p948_p13 = scmp.ne.s32.totalorder %s295_s25, %s947_s5  ;;  %p953_p1 = scmp.lt.s32.totalorder %s1185_s23, %s947_s5 }
  0xcc   : > { %p954_p2 = por %p953_p1, %p952_p0 }
  0xce   : > { %p955_p3 = pnand %p954_p2, %p948_p13 }
  0xd0   : > { %958 = shalt.err (!%p955_p3)  }
  0xd1   : > { %297 = dma.hbm_to_vmem [thread:$0]  %s284_s4, 16, %s295_s25, [#allocation3] }
  0xd2   : > { %s134_s19 = scalar_lea.vmem [#allocation9], %s1154_s10 }
  0xd3   : > { %1015 = dma.done.wait [#allocation3], 128 }
  0xd4   : > { %1016 = vsyncadd [#allocation3], 4294967168  ;;  %s676_s2 = sshll.u32 %s1035_s18, 7  ;;  %s477_s8 = sshll.u32 %s134_s19, 4  ;;  %v458_v0 = vld [vmem:[#allocation2] sm:$0xff]  ;;  %v459_v1 = vld [vmem:[#allocation6] sm:$0xff]  ;;  %s478_s8 = int_to_ptr.vmem [resolvable:$true] %s477_s8 }
  0xd5   : > { %v460_v2 = vadd.f32 %v459_v1, %v458_v0  ;;  %s475_s13 = scalar_lea.hbm %s1329_s3, %s676_s2  ;;  %s1342_s23 = sand.u32 1, %s1027_s16  }
  0xd6   : > { %s463_s25 = scalar_lea.sflag [#allocation8], %s1342_s23  ;;  %s959_s6 = scalar_lea.vmem %s478_s8, 128 }
  0xd7   : > { %461 = vst [vmem:[%s134_s19] sm:$0xff] %v460_v2  ;;  %p960_p5 = scmp.ne.s32.totalorder %s478_s8, %s959_s6  ;;  %s1048_s10 = smov [#allocation9]  }
  0xd8   : > { %s963_s14 = sshll.u32 %s1048_s10, 4  ;;  %s964_s14 = int_to_ptr.vmem [resolvable:$false] %s963_s14 }
  0xd9   : > { %p961_p6 = pnand %p960_p5, %p1112_p4  ;;  %s965_s18 = scalar_lea.vmem %s964_s14, 256 }
  0xda   : > { %p966_p9 = scmp.lt.s32.totalorder %s478_s8, %s964_s14  ;;  %p967_p10 = scmp.lt.s32.totalorder %s965_s18, %s959_s6 }
  0xdb   : > { %p962_p7 = pneg %p961_p6 }
  0xdc   : > { %p968_p11 = por %p967_p10, %p966_p9 }
  0xde   : > { %p969_p12 = pnand %p968_p11, %p962_p7 }
  0xe0   : > { %972 = shalt.err (!%p969_p12)
}
  0xe1   : > { %s973_s21 = scalar_lea.hbm %s475_s13, 128  ;;  %s977_s12 = scalar_lea.hbm %s1329_s3, 256 }
  0xe2   : > { %p974_p13 = scmp.ne.s32.totalorder %s475_s13, %s973_s21  ;;  %p978_p2 = scmp.lt.s32.totalorder %s475_s13, %s1329_s3 }
  0xe3   : > { %p979_p3 = scmp.lt.s32.totalorder %s977_s12, %s973_s21 }
  0xe4   : > { %p975_p0 = pnand %p974_p13, %p1112_p4 }
  0xe5   : > { %p980_p5 = por %p979_p3, %p978_p2 }
  0xe6   : > { %p976_p1 = pneg %p975_p0 }
  0xe8   : > { %p981_p6 = pnand %p980_p5, %p976_p1 }
  0xea   : > { %984 = shalt.err (!%p981_p6)
}
  0xeb   : > { %685 = dma.vmem_to_hbm [thread:$0]  (%p1112_p4), %s478_s8, 128, %s475_s13, %s463_s25  }
  0xec PF: > { %p697_p7 = scmp.ge.s32.totalorder %s1043_s20, 2  ;;  %s489_s4 = sand.u32 1, %s1023_s15  }
  0xed   : > { %s490_s27 = scalar_lea.sflag [#allocation8], %s489_s4 }
  0xee   : > { %p692_p9 = pnand %p697_p7, %p1119_p8 }
  0xf0   : > { %p693_p10 = pneg %p692_p9 }
  0xf2   : > { %1018 = dma.done.wait (%p693_p10), %s490_s27, 128  }
  0xf3   : > { %1020 = vsyncadd (%p693_p10), %s490_s27, 4294967168  ;;  %s21_s20 = sadd.s32 1, %s1043_s20   ;;  %s1343_s22 = sld [smem:[#allocation50_spill]] }
  0xf4   : > { %p18_p11 = scmp.ge.s32.totalorder %s21_s20, 4   ;;  %s1344_s18 = sld [smem:[#allocation48_spill]] }
  0xf5   : > { %s1345_s19 = sld [smem:[#allocation49_spill]]  ;;  %s1346_s15 = smov %s1027_s16 }
  0xf6   : > { %s1347_s16 = smov %s1031_s17  ;;  %20 = sbr.rel (!%p18_p11) target bundleno = 11 (0xb), region = 171 }
  0xf9   : > { %s1348_s17 = smov %s1343_s22 }
  0xfb   :  { %495 = vsyncpa [#allocation7], 1 }
  0xfc   :  { %497 = vsyncpa [#allocation7 + $0x1], 1 }
  0xfd   :  { %498 = vsyncpa [#allocation8], 1 }
  0xfe   :  { %500 = vsyncpa [#allocation8 + $0x1], 1 }
  0xff   :  { %501 = vsyncmov [#allocation3] }
 0x102   :  { %s502_s24 = vpop.sfrf %501 }
 0x103   :  { %p679_p4 = scmp.ne.s32.totalorder %s502_s24, 0 }
 0x105   :  { %506 = shalt.err (%p679_p4)  }
 0x106   :  { %508 = vsyncmov [#allocation3 + $0x1] }
 0x109   :  { %s509_s26 = vpop.sfrf %508 }
 0x10a   :  { %p680_p8 = scmp.ne.s32.totalorder %s509_s26, 0 }
 0x10c   :  { %513 = shalt.err (%p680_p8)  }

</bundles_post_ra>
